<compile_context>
chip_gen: v7x
topology: tpu7x:2x2x1
jax: 0.10.0
libtpu: 0.0.40
codegen_flags: <defaults>
</compile_context>

<pallas_src>
import functools

import jax
import jax.numpy as jnp
from jax.experimental import pallas as pl
from jax.experimental.pallas import tpu as pltpu


def _round_up(x: int, m: int) -> int:
    return (x + m - 1) // m * m


def _cdiv(a: int, b: int) -> int:
    return (a + b - 1) // b


def _mlp_kernel(x_ref, w1_ref, b1_ref, w2_ref, b2_ref, o_ref):
    # x:  [TB, F_in] f32      w1: [F_in, Hp] bf16   b1: [1, Hp] f32
    # w2: [Hp, Op]   bf16     b2: [1, Op]   f32     o:  [TB, Op] bf16
    x = x_ref[...].astype(jnp.bfloat16)                       # feed MXU bf16
    h = jnp.dot(x, w1_ref[...], preferred_element_type=jnp.float32)
    h = jnp.maximum(h + b1_ref[...], 0.0)                     # bias + ReLU in f32
    h = h.astype(jnp.bfloat16)
    o = jnp.dot(h, w2_ref[...], preferred_element_type=jnp.float32) + b2_ref[...]
    o_ref[...] = o.astype(o_ref.dtype)                        # bf16 lane-dense store


def prepare_params(w1, b1, w2, b2):
    """One-time prep: transpose to [in,out], zero-pad lane dims to 128, cast weights
    to bf16. Called once at init so no per-forward transpose/reshape ops remain.

    w1: [H, F_in]  (PyTorch layout), b1: [H]
    w2: [F_out, H] (PyTorch layout), b2: [F_out]

    Returns (params_dict_of_arrays, out_features).  out_features is kept OUT of the
    dict so it stays a static Python int under jit.
    """
    H, F_in = w1.shape
    F_out = w2.shape[0]
    Hp = _round_up(H, 128)       # 100 -> 128 (full MXU tiles, zero-padded cols are exact 0)
    Op = _round_up(F_out, 128)   # 10  -> 128 (lane-dense output stores)

    w1_t = jnp.zeros((F_in, Hp), jnp.bfloat16).at[:, :H].set(
        w1.T.astype(jnp.bfloat16))
    b1_p = jnp.zeros((1, Hp), jnp.float32).at[:, :H].set(b1.astype(jnp.float32))
    w2_t = jnp.zeros((Hp, Op), jnp.bfloat16).at[:H, :F_out].set(
        w2.T.astype(jnp.bfloat16))
    b2_p = jnp.zeros((1, Op), jnp.float32).at[:, :F_out].set(b2.astype(jnp.float32))

    params = {"w1": w1_t, "b1": b1_p, "w2": w2_t, "b2": b2_p}
    return params, F_out


def _pick_batch_tiling(B: int):
    """Choose (TB, B_pad, steps) as static Python ints.

    - B < 8: one full-array block (exempt from the (8,128) rule), no padding.
    - otherwise: pad to sublane multiple of 8 only, >=2 steps when possible so both
      v7x TensorCores work, tiles capped at 1024 rows; waste <= 8*(steps-1) rows.
    """
    if B < 8:
        return B, B, 1
    B8 = _round_up(B, 8)
    if B8 < 16:
        return B8, B8, 1
    steps = max(2, _cdiv(B8, 1024))
    TB = _round_up(_cdiv(B8, steps), 8)
    return TB, TB * steps, steps


@functools.partial(jax.jit, static_argnames=("out_features",))
def simple_mlp_forward(x_nchw, params, *, out_features):
    """Flatten -> Linear -> ReLU -> Linear, matching SimpleMLP.forward."""
    B = x_nchw.shape[0]
    xf = x_nchw.reshape(B, -1).astype(jnp.float32)            # Flatten (glue)
    F_in = xf.shape[1]
    Hp = params["w1"].shape[1]
    Op = params["w2"].shape[1]

    TB, B_pad, steps = _pick_batch_tiling(B)
    if B_pad != B:
        xf = jnp.pad(xf, ((0, B_pad - B), (0, 0)))

    out = pl.pallas_call(
        _mlp_kernel,
        out_shape=jax.ShapeDtypeStruct((B_pad, Op), jnp.bfloat16),
        grid=(steps,),
        in_specs=[
            pl.BlockSpec((TB, F_in), lambda i: (i, 0)),   # activations: tiled on batch
            pl.BlockSpec((F_in, Hp), lambda i: (0, 0)),   # weights: VMEM-resident
            pl.BlockSpec((1, Hp),    lambda i: (0, 0)),
            pl.BlockSpec((Hp, Op),   lambda i: (0, 0)),
            pl.BlockSpec((1, Op),    lambda i: (0, 0)),
        ],
        out_specs=pl.BlockSpec((TB, Op), lambda i: (i, 0)),   # lane-dense [TB,128]
        compiler_params=pltpu.CompilerParams(
            dimension_semantics=("parallel",)),               # batch axis -> both v7x TCs
    )(xf, params["w1"], params["b1"], params["w2"], params["b2"])

    # out_features is a static int here, so slicing is legal under jit.
    if B_pad != B or Op != out_features:
        out = out[:B, :out_features]
    return out.astype(jnp.float32)


def _init_linear(key, out_features, in_features, dtype=jnp.float32):
    """Matches the spec's Linear init: U(-1/sqrt(in), 1/sqrt(in)) for weight & bias."""
    kw, kb = jax.random.split(key)
    bound = 1.0 / (in_features ** 0.5)
    w = jax.random.uniform(kw, (out_features, in_features), dtype, -bound, bound)
    b = jax.random.uniform(kb, (out_features,), dtype, -bound, bound)
    return w, b


if __name__ == "__main__":
    key = jax.random.PRNGKey(0)
    kx, k1, k2 = jax.random.split(key, 3)

    # SimpleMLP shapes: MNIST-like input [B, 1, 28, 28] -> 784 -> 100 -> 10
    B, C, Hh, Ww = 2, 1, 28, 28
    F_in, HID, F_out = C * Hh * Ww, 100, 10

    x = jax.random.normal(kx, (B, C, Hh, Ww), jnp.float32)
    w1, b1 = _init_linear(k1, HID, F_in)
    w2, b2 = _init_linear(k2, F_out, HID)

    params, out_features = prepare_params(w1, b1, w2, b2)  # one-time prep

    out = simple_mlp_forward(x, params, out_features=out_features)
    out = jax.block_until_ready(out)

    # Pure-JAX f32 reference of SimpleMLP.forward.
    xf = x.reshape(B, -1)
    ref = jnp.maximum(xf @ w1.T + b1, 0.0) @ w2.T + b2
    assert out.shape == (B, F_out), out.shape
    # Looser tolerance: kernel feeds bf16 operands to the MXU (f32 accumulate) and
    # writes bf16 logits.
    assert jnp.allclose(out, ref, atol=5e-2, rtol=5e-2), "mismatch vs reference"

    print("KERNEL_OK")
</pallas_src>

<mosaic_0001>
module attributes {stable_mosaic.version = 11 : i64} {
  func.func @_mlp_kernel(%arg0: i32, %arg1: memref<2x784xf32, #tpu.memory_space<vmem>>, %arg2: memref<784x128xbf16, #tpu.memory_space<vmem>>, %arg3: memref<1x128xf32, #tpu.memory_space<vmem>>, %arg4: memref<128x128xbf16, #tpu.memory_space<vmem>>, %arg5: memref<1x128xf32, #tpu.memory_space<vmem>>, %arg6: memref<2x128xbf16, #tpu.memory_space<vmem>>) attributes {dimension_semantics = [#tpu.dimension_semantics<parallel>], iteration_bounds = array<i64: 1>, scalar_prefetch = 0 : i64, scratch_operands = 0 : i64, tpu.core_type = #tpu.core_type<tc>, window_params = [{transform_indices = @transform_0, window_bounds = array<i64: 2, 784>}, {pipeline_mode = #tpu.pipeline_mode<synchronous>, transform_indices = @transform_1, window_bounds = array<i64: 784, 128>}, {pipeline_mode = #tpu.pipeline_mode<synchronous>, transform_indices = @transform_2, window_bounds = array<i64: 1, 128>}, {pipeline_mode = #tpu.pipeline_mode<synchronous>, transform_indices = @transform_3, window_bounds = array<i64: 128, 128>}, {pipeline_mode = #tpu.pipeline_mode<synchronous>, transform_indices = @transform_4, window_bounds = array<i64: 1, 128>}, {transform_indices = @transform_5, window_bounds = array<i64: 2, 128>}]} {
    %c0 = arith.constant 0 : index
    %c0_0 = arith.constant 0 : index
    %0 = vector.load %arg1[%c0, %c0_0] : memref<2x784xf32, #tpu.memory_space<vmem>>, vector<2x784xf32>
    %1 = arith.truncf %0 : vector<2x784xf32> to vector<2x784xbf16>
    %c0_1 = arith.constant 0 : index
    %c0_2 = arith.constant 0 : index
    %2 = vector.load %arg2[%c0_1, %c0_2] : memref<784x128xbf16, #tpu.memory_space<vmem>>, vector<784x128xbf16>
    %cst = arith.constant dense<0.000000e+00> : vector<2x128xf32>
    %3 = tpu.matmul %1, %2, %cst {dimension_numbers = #tpu.dot_dimension_numbers<[1], [0], [0], [1], [0, 0, 1, 1], [], []>} : vector<2x784xbf16>, vector<784x128xbf16>, vector<2x128xf32> -> vector<2x128xf32>
    %c0_3 = arith.constant 0 : index
    %c0_4 = arith.constant 0 : index
    %4 = vector.load %arg3[%c0_3, %c0_4] : memref<1x128xf32, #tpu.memory_space<vmem>>, vector<1x128xf32>
    %5 = vector.broadcast %4 : vector<1x128xf32> to vector<2x128xf32>
    %6 = arith.addf %3, %5 : vector<2x128xf32>
    %cst_5 = arith.constant 0.000000e+00 : f32
    %7 = vector.broadcast %cst_5 : f32 to vector<2x128xf32>
    %8 = arith.maximumf %6, %7 : vector<2x128xf32>
    %9 = arith.truncf %8 : vector<2x128xf32> to vector<2x128xbf16>
    %c0_6 = arith.constant 0 : index
    %c0_7 = arith.constant 0 : index
    %10 = vector.load %arg4[%c0_6, %c0_7] : memref<128x128xbf16, #tpu.memory_space<vmem>>, vector<128x128xbf16>
    %cst_8 = arith.constant dense<0.000000e+00> : vector<2x128xf32>
    %11 = tpu.matmul %9, %10, %cst_8 {dimension_numbers = #tpu.dot_dimension_numbers<[1], [0], [0], [1], [0, 0, 1, 1], [], []>} : vector<2x128xbf16>, vector<128x128xbf16>, vector<2x128xf32> -> vector<2x128xf32>
    %c0_9 = arith.constant 0 : index
    %c0_10 = arith.constant 0 : index
    %12 = vector.load %arg5[%c0_9, %c0_10] : memref<1x128xf32, #tpu.memory_space<vmem>>, vector<1x128xf32>
    %13 = vector.broadcast %12 : vector<1x128xf32> to vector<2x128xf32>
    %14 = arith.addf %11, %13 : vector<2x128xf32>
    %15 = arith.truncf %14 : vector<2x128xf32> to vector<2x128xbf16>
    %c0_11 = arith.constant 0 : index
    %c0_12 = arith.constant 0 : index
    %16 = vector.load %arg6[%c0_11, %c0_12] : memref<2x128xbf16, #tpu.memory_space<vmem>>, vector<2x128xbf16>
    tpu.vector_store %arg6[%c0_11, %c0_12], %15 {strides = array<i32>} : memref<2x128xbf16, #tpu.memory_space<vmem>>, vector<2x128xbf16>,
    return
  }
  func.func @transform_0(%arg0: i32) -> (i32, i32) {
    %c0_i32 = arith.constant 0 : i32
    %c0_i32_0 = arith.constant 0 : i32
    return %arg0, %c0_i32 : i32, i32
  }
  func.func @transform_1(%arg0: i32) -> (i32, i32) {
    %c0_i32 = arith.constant 0 : i32
    %c0_i32_0 = arith.constant 0 : i32
    %c0_i32_1 = arith.constant 0 : i32
    return %c0_i32, %c0_i32_0 : i32, i32
  }
  func.func @transform_2(%arg0: i32) -> (i32, i32) {
    %c0_i32 = arith.constant 0 : i32
    %c0_i32_0 = arith.constant 0 : i32
    %c0_i32_1 = arith.constant 0 : i32
    return %c0_i32, %c0_i32_0 : i32, i32
  }
  func.func @transform_3(%arg0: i32) -> (i32, i32) {
    %c0_i32 = arith.constant 0 : i32
    %c0_i32_0 = arith.constant 0 : i32
    %c0_i32_1 = arith.constant 0 : i32
    return %c0_i32, %c0_i32_0 : i32, i32
  }
  func.func @transform_4(%arg0: i32) -> (i32, i32) {
    %c0_i32 = arith.constant 0 : i32
    %c0_i32_0 = arith.constant 0 : i32
    %c0_i32_1 = arith.constant 0 : i32
    return %c0_i32, %c0_i32_0 : i32, i32
  }
  func.func @transform_5(%arg0: i32) -> (i32, i32) {
    %c0_i32 = arith.constant 0 : i32
    %c0_i32_0 = arith.constant 0 : i32
    return %arg0, %c0_i32 : i32, i32
  }
}

</mosaic_0001>

<bundles_post_ra>
// kernel: simple_mlp_forward.1
= control target key start
LH: loop header
LB: loop body
LE: loop exit
PB: predicated region body
PF: predicated region fallthrough
CT: control target
= control target key end

     0   :  { %10 = vsyncpa [#allocation3], 0  ;;  %s1021_s18 = smov [#allocation2]   ;;  %s1122_s0 = inlined_call_operand.vmem [shape: f32[2,784], index: 0, kind: input, shape index: {}]   ;;  %s1123_s1 = inlined_call_operand.hbm [shape: bf16[784,128], index: 1, kind: input, shape index: {}]   ;;  %s1124_s2 = inlined_call_operand.vmem [shape: f32[1,128], index: 2, kind: input, shape index: {}]   ;;  %s1125_s3 = inlined_call_operand.vmem [shape: bf16[128,128], index: 3, kind: input, shape index: {}]   ;;  %s1126_s4 = inlined_call_operand.vmem [shape: f32[1,128], index: 4, kind: input, shape index: {}]   ;;  %s1127_s5 = inlined_call_operand.vmem [shape: bf16[2,128], index: 5, kind: output, shape index: {}]  }
   0x1   :  { %s18_s19 = sshll.u32 %s1021_s18, 4  ;;  %s997_s22 = scalar_lea.hbm %s1123_s1, 6272  ;;  %s19_s19 = int_to_ptr.vmem [resolvable:$true] %s18_s19 }
   0x2   :  { %p998_p0 = scmp.ne.s32.totalorder %s1123_s1, %s997_s22  ;;  %p1001_p1 = scmp.lt.u32.totalorder %s997_s22, %s1123_s1 }
   0x4   :  { %p1003_p2 = pnand %p1001_p1, %p998_p0 }
   0x6   :  { %1006 = shalt.err (!%p1003_p2)
}
   0x7   :  { %s1007_s27 = scalar_lea.vmem %s19_s19, 6272  ;;  %p1012_p4 = scmp.lt.s32.totalorder %s19_s19, %s19_s19 }
   0x8   :  { %p1008_p3 = scmp.ne.s32.totalorder %s19_s19, %s1007_s27  ;;  %p1013_p5 = scmp.lt.s32.totalorder %s1007_s27, %s1007_s27 }
   0xa   :  { %p1014_p6 = por %p1013_p5, %p1012_p4 }
   0xc   :  { %p1015_p7 = pnand %p1014_p6, %p1008_p3 }
   0xe   :  { %1018 = shalt.err (!%p1015_p7)
}
   0xf   :  { %s1022_s28 = smov 64   ;;  %s1023_s29 = smov 4  }
  0x10   :  { %24 = dma.hbm_to_vmem [thread:$0]  %s1123_s1, 6272, %s19_s19, [#allocation3], %s1022_s28, %s1022_s28, %s1023_s29  }
  0x11   :  { %1019 = dma.done.wait [#allocation3], 6272  }
  0x12   :  { %1020 = vsyncadd [#allocation3], 4294961024  ;;  %v938_v0 = vld [vmem:[#allocation2 + $0x40] sm:$0xff]   ;;  %v942_v4 = vld [vmem:[#allocation2 + $0x48] sm:$0xff]   ;;  %v1024_v21 = vmov 1983009808   ;;  %v43_v23 = vlaneseq }
  0x13   :  { %v939_v1 = vld [vmem:[#allocation2] sm:$0xff]   ;;  %829 = vmatprep.subr.bf16.mxu0 %v938_v0  ;;  %v943_v5 = vld [vmem:[#allocation2 + $0x8] sm:$0xff]   ;;  %v946_v8 = vld [vmem:[#allocation2 + $0x50] sm:$0xff]   ;;  %v41_v22 = vunpack.c.l.s4 %v1024_v21  ;;  %v1025_v45 = vmov 0.0   ;;  %vm1026_vm0 = vmmov 0   ;;  %vm485_vm1 = vcmask 130048  }
  0x14   :  { %v940_v2 = vld [vmem:[#allocation2 + $0xc0] sm:$0xff]   ;;  %830 = vmatpush3.bf16.msra.mxu0 %v939_v1  ;;  %v944_v6 = vld [vmem:[#allocation2 + $0xc8] sm:$0xff]   ;;  %v947_v9 = vld [vmem:[#allocation2 + $0x10] sm:$0xff]   ;;  %v44_v29 = vshrl.u32 %v43_v23, 7 }
  0x15   :  { %v941_v3 = vld [vmem:[#allocation2 + $0x80] sm:$0xff]   ;;  %851 = vmatprep.subr.bf16.mxu1 %v940_v2  ;;  %831 = vmatprep.subr.bf16.mxu0 %v942_v4  ;;  %v945_v7 = vld [vmem:[#allocation2 + $0x88] sm:$0xff]   ;;  %v948_v10 = vld [vmem:[#allocation2 + $0xd0] sm:$0xff]   ;;  %v42_v28 = vunpack.c.0.s8 %v41_v22 }
  0x16   :  { %852 = vmatpush3.bf16.msra.mxu1 %v941_v3  ;;  %v949_v11 = vld [vmem:[#allocation2 + $0x90] sm:$0xff]   ;;  %v950_v12 = vld [vmem:[#allocation2 + $0x58] sm:$0xff]   ;;  %v954_v16 = vld [vmem:[#allocation2 + $0x60] sm:$0xff]  }
  0x17   :  { %853 = vmatprep.subr.bf16.mxu1 %v944_v6  ;;  %v951_v13 = vld [vmem:[#allocation2 + $0x18] sm:$0xff]   ;;  %v955_v17 = vld [vmem:[#allocation2 + $0x20] sm:$0xff]   ;;  %v958_v20 = vld [vmem:[#allocation2 + $0x68] sm:$0xff]   ;;  %v45_v34 = vsub.s32 %v42_v28, %v44_v29 }
  0x18   :  { %832 = vmatpush3.bf16.msra.mxu0 %v943_v5  ;;  %v952_v14 = vld [vmem:[#allocation2 + $0xd8] sm:$0xff]   ;;  %v956_v18 = vld [vmem:[#allocation2 + $0xe0] sm:$0xff]   ;;  %v959_v24 = vld [vmem:[#allocation2 + $0x28] sm:$0xff]  }
  0x19   :  { %833 = vmatprep.subr.bf16.mxu0 %v946_v8  ;;  %v953_v15 = vld [vmem:[#allocation2 + $0x98] sm:$0xff]   ;;  %v957_v19 = vld [vmem:[#allocation2 + $0xa0] sm:$0xff]   ;;  %v960_v25 = vld [vmem:[#allocation2 + $0xe8] sm:$0xff]  }
  0x1a   :  { %854 = vmatpush3.bf16.msra.mxu1 %v945_v7  ;;  %v961_v26 = vld [vmem:[#allocation2 + $0xa8] sm:$0xff]   ;;  %v962_v27 = vld [vmem:[#allocation2 + $0x70] sm:$0xff]   ;;  %v966_v33 = vld [vmem:[#allocation2 + $0x78] sm:$0xff]  }
  0x1b   :  { %855 = vmatprep.subr.bf16.mxu1 %v948_v10  ;;  %v963_v30 = vld [vmem:[#allocation2 + $0x30] sm:$0xff]   ;;  %v967_v35 = vld [vmem:[#allocation2 + $0x38] sm:$0xff]   ;;  %v35_v37 = vld [vmem:[%s1122_s0] sm:$0xff] }
  0x1c   :  { %834 = vmatpush3.bf16.msra.mxu0 %v947_v9  ;;  %v964_v31 = vld [vmem:[#allocation2 + $0xf0] sm:$0xff]   ;;  %v968_v36 = vld [vmem:[#allocation2 + $0xf8] sm:$0xff]   ;;  %v46_v38 = vrot.slane %v35_v37, %v45_v34  ;;  %v39_v40 = vcombine.high %v35_v37, %v35_v37  ;;  %v970_v41 = vld [vmem:[#allocation2 + $0x140] sm:$0xff]  }
  0x1d   :  { %835 = vmatprep.subr.bf16.mxu0 %v950_v12  ;;  %v965_v32 = vld [vmem:[#allocation2 + $0xb0] sm:$0xff]   ;;  %v969_v39 = vld [vmem:[#allocation2 + $0xb8] sm:$0xff]   ;;  %v972_v48 = vld [vmem:[#allocation2 + $0x100] sm:$0xff]  }
  0x1e   :  { %856 = vmatpush3.bf16.msra.mxu1 %v949_v11  ;;  %v54_v42 = vcombine.high %v46_v38, %v46_v38  ;;  %v53_v43 = vrot.slane %v39_v40, %v45_v34  ;;  %v79_v44 = vpack.c.bf16 %v46_v38, %v46_v38  ;;  %v973_v50 = vld [vmem:[#allocation2 + $0x148] sm:$0xff]   ;;  %v975_v53 = vld [vmem:[#allocation2 + $0x150] sm:$0xff]   ;;  %v977_v55 = vld [vmem:[#allocation2 + $0x158] sm:$0xff]  }
  0x1f   :  { %857 = vmatprep.subr.bf16.mxu1 %v952_v14  ;;  %v974_v52 = vld [vmem:[#allocation2 + $0x108] sm:$0xff]   ;;  %v976_v54 = vld [vmem:[#allocation2 + $0x110] sm:$0xff]   ;;  %v978_v56 = vld [vmem:[#allocation2 + $0x118] sm:$0xff]  }
  0x20   :  { %836 = vmatpush3.bf16.msra.mxu0 %v951_v13  ;;  %v80_v46 = vpack.c.bf16 %v54_v42, %v54_v42  ;;  %v55_v47 = vcombine.high %v53_v43, %v53_v43  ;;  %v81_v49 = vpack.c.bf16 %v53_v43, %v53_v43  ;;  %v979_v57 = vld [vmem:[#allocation2 + $0x160] sm:$0xff]   ;;  %v36_v59 = vld [vmem:[%s1122_s0 + $0x8] sm:$0x3f]  ;;  %v983_v5 = vld [vmem:[#allocation2 + $0x170] sm:$0xff]  }
  0x21   :  { %837 = vmatprep.subr.bf16.mxu0 %v954_v16  ;;  %v987_v58 = vld [vmem:[#allocation2 + $0x180] sm:$0xff]   ;;  %v56_v61 = vcombine.high %v36_v59, %v36_v59  ;;  %v63_v62 = vrot.slane %v36_v59, %v45_v34  ;;  %v981_v63 = vld [vmem:[#allocation2 + $0x168] sm:$0xff]   ;;  %v984_v6 = vld [vmem:[#allocation2 + $0x130] sm:$0xff]  }
  0x22   :  { %858 = vmatpush3.bf16.msra.mxu1 %v953_v15  ;;  %521 = vmatprep.mubr.bf16.mxu0 %v80_v46  ;;  %v82_v51 = vpack.c.bf16 %v55_v47, %v55_v47  ;;  %v980_v60 = vld [vmem:[#allocation2 + $0x120] sm:$0xff]   ;;  %v982_v4 = vld [vmem:[#allocation2 + $0x128] sm:$0xff]   ;;  %v985_v7 = vld [vmem:[#allocation2 + $0x178] sm:$0xff]  }
  0x23   :  { %859 = vmatprep.subr.bf16.mxu1 %v956_v18  ;;  %v70_v0 = vrot.slane %v56_v61, %v45_v34  ;;  %v71_v1 = vcombine.high %v63_v62, %v63_v62  ;;  %v986_v8 = vld [vmem:[#allocation2 + $0x138] sm:$0xff]   ;;  %v83_v9 = vpack.c.bf16 %v63_v62, %v63_v62  ;;  %v989_v10 = vld [vmem:[%s1125_s3] sm:$0xff]   ;;  %v990_v11 = vld [vmem:[%s1125_s3 + $0x8] sm:$0xff]  }
  0x24   :  { %838 = vmatpush3.bf16.msra.mxu0 %v955_v17  ;;  %561 = vmatprep.mubr.bf16.mxu1 %v82_v51  ;;  %v991_v12 = vld [vmem:[%s1125_s3 + $0x10] sm:$0xff]   ;;  %v992_v13 = vld [vmem:[%s1125_s3 + $0x18] sm:$0xff]   ;;  %v993_v14 = vld [vmem:[%s1125_s3 + $0x20] sm:$0xff]  }
  0x25   :  { %839 = vmatprep.subr.bf16.mxu0 %v958_v20  ;;  %v84_v2 = vpack.c.bf16 %v71_v1, %v71_v1  ;;  %v85_v3 = vpack.c.bf16 %v70_v0, %v70_v0  ;;  %v994_v15 = vld [vmem:[%s1125_s3 + $0x28] sm:$0xff]   ;;  %v995_v16 = vld [vmem:[%s1125_s3 + $0x30] sm:$0xff]   ;;  %v996_v17 = vld [vmem:[%s1125_s3 + $0x38] sm:$0xff]  }
  0x26   :  { %860 = vmatpush3.bf16.msra.mxu1 %v957_v19  ;;  %v769_v19 = vld [vmem:[%s1124_s2] ss:$0 sm:$0xff] }
  0x27   :  { %861 = vmatprep.subr.bf16.mxu1 %v960_v25 }
  0x28   :  { %840 = vmatpush3.bf16.msra.mxu0 %v959_v24 }
  0x29   :  { %841 = vmatprep.subr.bf16.mxu0 %v962_v27 }
  0x2a   :  { %862 = vmatpush3.bf16.msra.mxu1 %v961_v26 }
  0x2b   :  { %863 = vmatprep.subr.bf16.mxu1 %v964_v31 }
  0x2c   :  { %842 = vmatpush3.bf16.msra.mxu0 %v963_v30 }
  0x2d   :  { %843 = vmatprep.subr.bf16.mxu0 %v966_v33 }
  0x2e   :  { %864 = vmatpush3.bf16.msra.mxu1 %v965_v32 }
  0x2f   :  { %865 = vmatprep.subr.bf16.mxu1 %v968_v36 }
  0x30   :  { %844 = vmatpush3.bf16.msra.mxu0 %v967_v35 }
  0x31   :  { %873 = vmatprep.subr.bf16.mxu0 %v970_v41 }
  0x32   :  { %866 = vmatpush3.bf16.msra.mxu1 %v969_v39 }
  0x33   :  { %906 = vmatprep.subr.bf16.mxu1 %v1025_v45  ;;  %522 = vmatmul.mubr.bf16.vlgmr.msra.gmra.mrb[0].mxu0 %v79_v44  ;;  %v820_v44 = vld [vmem:[%s1126_s4] ss:$0 sm:$0xff] }
  0x34   :  { %874 = vmatpush3.bf16.msra.mxu0 %v972_v48  ;;  %601 = vmatprep.mubr.bf16.mxu0 %v84_v2 }
  0x35   :  { %562 = vmatmul.mubr.bf16.vlgmr.msra.gmra.mrb[0].mxu1 %v81_v49  ;;  %875 = vmatprep.subr.bf16.mxu0 %v973_v50 }
  0x36   :  { %908 = vmatprep.mubr.msk.bf16.mxu1 %vm1026_vm0, %v1025_v45  ;;  %907 = vmatpush3.bf16.msra.mxu1 %v987_v58 }
  0x37   :  { %912 = vmatprep.subr.bf16.mxu1 %v1025_v45 }
  0x38   :  { %876 = vmatpush3.bf16.msra.mxu0 %v974_v52 }
  0x39   :  { %877 = vmatprep.subr.bf16.mxu0 %v975_v53 }
  0x3c   :  { %878 = vmatpush3.bf16.msra.mxu0 %v976_v54 }
  0x3d   :  { %879 = vmatprep.subr.bf16.mxu0 %v977_v55  ;;  %909 = vmatmul.mubr.msk.bf16.vlgmr.msra.gmra.mrb[4].mxu1 %vm485_vm1, %v85_v3 }
  0x3e   :  { %928 = vmatprep.mubr.msk.bf16.mxu1 %vm1026_vm0, %v1025_v45  ;;  %913 = vmatpush3.bf16.msra.mxu1 %v989_v10 }
  0x3f   :  { %914 = vmatprep.subr.bf16.mxu1 %v1025_v45 }
  0x40   :  { %880 = vmatpush3.bf16.msra.mxu0 %v978_v56 }
  0x41   :  { %881 = vmatprep.subr.bf16.mxu0 %v979_v57 }
  0x42   :  { %915 = vmatpush3.bf16.msra.mxu1 %v990_v11 }
  0x43   :  { %916 = vmatprep.subr.bf16.mxu1 %v1025_v45 }
  0x44   :  { %882 = vmatpush3.bf16.msra.mxu0 %v980_v60 }
  0x45   :  { %883 = vmatprep.subr.bf16.mxu0 %v981_v63 }
  0x46   :  { %917 = vmatpush3.bf16.msra.mxu1 %v991_v12 }
  0x47   :  { %918 = vmatprep.subr.bf16.mxu1 %v1025_v45 }
  0x48   :  { %884 = vmatpush3.bf16.msra.mxu0 %v982_v4 }
  0x49   :  { %885 = vmatprep.subr.bf16.mxu0 %v983_v5 }
  0x4a   :  { %919 = vmatpush3.bf16.msra.mxu1 %v992_v13 }
  0x4b   :  { %920 = vmatprep.subr.bf16.mxu1 %v1025_v45 }
  0x4c   :  { %886 = vmatpush3.bf16.msra.mxu0 %v984_v6 }
  0x4d   :  { %887 = vmatprep.subr.bf16.mxu0 %v985_v7 }
  0x4e   :  { %921 = vmatpush3.bf16.msra.mxu1 %v993_v14 }
  0x4f   :  { %922 = vmatprep.subr.bf16.mxu1 %v1025_v45 }
  0x50   :  { %888 = vmatpush3.bf16.msra.mxu0 %v986_v8 }
  0x52   :  { %923 = vmatpush3.bf16.msra.mxu1 %v994_v15 }
  0x53   :  { %602 = vmatmul.mubr.bf16.vlgmr.msra.gmra.mrb[4].mxu0 %v83_v9  ;;  %924 = vmatprep.subr.bf16.mxu1 %v1025_v45 }
  0x56   :  { %925 = vmatpush3.bf16.msra.mxu1 %v995_v16 }
  0x57   :  { %926 = vmatprep.subr.bf16.mxu1 %v1025_v45 }
  0x5a   :  { %927 = vmatpush3.bf16.msra.mxu1 %v996_v17 }
 0x106   :  { %v845_v18 = vpop.f32.mrb[0].mxu0 }
 0x107   :  { %v846_v20 = vpop.f32.mrb[1].mxu0 }
 0x108   :  { %v847_v21 = vadd.f32 %v846_v20, %v845_v18  ;;  %v848_v22 = vpop.f32.mrb[2].mxu0  ;;  %v867_v23 = vpop.f32.mrb[0].mxu1 }
 0x109   :  { %v849_v24 = vpop.f32.mrb[3].mxu0  ;;  %v868_v25 = vpop.f32.mrb[1].mxu1 }
 0x10a   :  { %v524_v26 = vadd.f32 %v847_v21, %v769_v19  ;;  %v869_v27 = vadd.f32 %v868_v25, %v867_v23  ;;  %v870_v28 = vpop.f32.mrb[2].mxu1 }
 0x10b   :  { %v871_v29 = vpop.f32.mrb[3].mxu1 }
 0x10c   :  { %v564_v30 = vadd.f32 %v869_v27, %v524_v26 }
 0x110   :  { %v643_v31 = vpop.f32.mrb[4].mxu1 }
 0x111   :  { %v910_v32 = vpop.f32.mrb[5].mxu1 }
 0x112   :  { %v646_v33 = vpop.f32.mrb[6].mxu1 }
 0x113   :  { %v911_v34 = vpop.f32.mrb[7].mxu1 }
 0x126   :  { %v889_v35 = vpop.f32.mrb[4].mxu0 }
 0x127   :  { %v890_v36 = vpop.f32.mrb[5].mxu0 }
 0x128   :  { %v891_v37 = vadd.f32 %v890_v36, %v889_v35  ;;  %v892_v38 = vpop.f32.mrb[6].mxu0 }
 0x129   :  { %v893_v39 = vpop.f32.mrb[7].mxu0 }
 0x12a   :  { %v604_v40 = vadd.f32 %v891_v37, %v564_v30 }
 0x12c   :  { %v644_v41 = vadd.f32 %v643_v31, %v604_v40 }
 0x12e   :  { %v649_v42 = vmax.f32 %v644_v41, 0.0 }
 0x130   :  { %v650_v43 = vpack.c.bf16 %v649_v42, %v649_v42 }
 0x132   :  { %929 = vmatmul.mubr.bf16.vlgmr.msra.gmra.mrb[8].mxu1 %v650_v43 }
 0x205   :  { %v756_v45 = vpop.f32.mrb[8].mxu1 }
 0x206   :  { %v757_v46 = vadd.f32 %v820_v44, %v756_v45  ;;  %v930_v47 = vpop.f32.mrb[9].mxu1 }
 0x207   :  { %v759_v48 = vpop.f32.mrb[10].mxu1 }
 0x208   :  { %v762_v49 = vpack.c.bf16 %v757_v46, %v757_v46  ;;  %v931_v50 = vpop.f32.mrb[11].mxu1 }
 0x20a   :  { %763 = vst [vmem:[%s1127_s5] sm:$0x1] %v762_v49 }
 0x20b   :  { %768 = vsyncpa [#allocation3], 1 }

</bundles_post_ra>
